<compile_context>
chip_gen: v5e
topology: v5e:2x2
jax: 0.10.0
libtpu: 0.0.40
codegen_flags: <defaults>
</compile_context>

<pallas_src>
import math

import jax
import jax.numpy as jnp
from jax.experimental import pallas as pl
from jax.experimental.pallas import tpu as pltpu


# ----------------------------------------------------------------------------
# kernels
# ----------------------------------------------------------------------------

def _cosine_logits(x_tile, w_tile):
    """(tb, tc) cosine-similarity tile; normalization deferred to the output."""
    # MXU matmul in the storage dtype, f32 accumulation, contracting last dims
    # directly (transposed-RHS form) so no XLU transpose of the W tile.
    raw = jax.lax.dot_general(
        x_tile, w_tile,
        dimension_numbers=(((1,), (1,)), ((), ())),
        preferred_element_type=jnp.float32)                       # (tb, tc)

    xf = x_tile.astype(jnp.float32)
    wf = w_tile.astype(jnp.float32)
    # torch F.normalize: x / max(||x||, 1e-12)  ==  x * rsqrt(max(||x||^2, 1e-24))
    inv_x = jax.lax.rsqrt(
        jnp.maximum(jnp.sum(xf * xf, axis=-1, keepdims=True), 1e-24))  # (tb, 1)
    inv_w = jax.lax.rsqrt(
        jnp.maximum(jnp.sum(wf * wf, axis=-1), 1e-24))                 # (tc,)
    return raw * inv_x * inv_w


def _adacos_infer_kernel(x_ref, w_ref, logits_ref):
    # inference path (label is None): logits = normalize(x) @ normalize(W).T
    logits_ref[...] = _cosine_logits(x_ref[...], w_ref[...])


def _adacos_train_kernel(x_ref, w_ref, label_ref, s_ref,
                         logits_ref, esum_ref, tgt_ref):
    # training path: also accumulate (over the class-tile grid axis)
    #   esum[i] = sum_c exp(s_old * logits[i, c])      (all classes, padded too)
    #   tgt[i]  = logits[i, label[i]]
    c_idx = pl.program_id(1)

    @pl.when(c_idx == 0)
    def _init():
        esum_ref[...] = jnp.zeros_like(esum_ref)
        tgt_ref[...] = jnp.zeros_like(tgt_ref)

    logits = _cosine_logits(x_ref[...], w_ref[...])
    logits_ref[...] = logits

    tb, tc = logits.shape
    cls = jax.lax.broadcasted_iota(jnp.int32, (tb, tc), 1) + c_idx * tc
    one_hot = cls == label_ref[...]                   # (tb, tc) vs (tb, 1)

    s_old = s_ref[0]
    esum_ref[...] += jnp.sum(jnp.exp(s_old * logits), axis=-1, keepdims=True)
    tgt_ref[...] += jnp.sum(jnp.where(one_hot, logits, 0.0),
                            axis=-1, keepdims=True)


# ----------------------------------------------------------------------------
# wrapper
# ----------------------------------------------------------------------------

def _round_up(n, m):
    return ((n + m - 1) // m) * m


def adacos_forward(x, W, s, label=None, *, block_b=None, block_c=None):
    """Functional AdaCos forward.

    label is None  -> returns cosine logits (B, C)
    label is given -> returns (s_new * logits, s_new)   [s threaded functionally]
    """
    B, F = x.shape
    C, Fw = W.shape
    assert Fw == F
    itemsize = jnp.dtype(W.dtype).itemsize

    # --- tile sizes ----------------------------------------------------------
    # Batch tile: whole (padded) batch when small; cap keeps the logits tile
    # inside the VMEM budget.
    if block_b is None:
        block_b = min(_round_up(B, 8), 256)
    tb = block_b
    B_pad = _round_up(B, tb)

    # Class tile: W streams HBM->VMEM once (double buffered).  Budget ~4 MiB
    # per W buffer so the pipeline also fits v7x's 64 MiB-VMEM parts.
    # TODO(synk): F (contraction dim) is kept whole; extremely large F would
    # need an extra K-tiling pass with an f32 accumulator.
    if block_c is None:
        w_budget = 4 * 1024 * 1024
        block_c = max(128, min((w_budget // (F * itemsize)) // 128 * 128, 2048))
        block_c = min(block_c, _round_up(C, 128))
    tc = block_c
    C_pad = _round_up(C, tc)                 # lane-dense logits (multiple of 128)

    nb, nc = B_pad // tb, C_pad // tc

    # Zero padding: padded W rows / x rows produce logits that are exactly 0.0
    # (corrected / sliced away below).
    x_p = jnp.pad(x, ((0, B_pad - B), (0, 0))) if B_pad != B else x
    W_p = jnp.pad(W, ((0, C_pad - C), (0, 0))) if C_pad != C else W

    x_spec = pl.BlockSpec((tb, F), lambda b, c: (b, 0))
    w_spec = pl.BlockSpec((tc, F), lambda b, c: (c, 0))
    logits_spec = pl.BlockSpec((tb, tc), lambda b, c: (b, c))
    col_spec = pl.BlockSpec((tb, 1), lambda b, c: (b, 0))       # resident over c
    smem_spec = pl.BlockSpec(memory_space=pltpu.MemorySpace.SMEM)

    cparams = pltpu.CompilerParams(
        dimension_semantics=("parallel", "arbitrary"),
        vmem_limit_bytes=32 * 1024 * 1024)

    if label is None:
        logits_p = pl.pallas_call(
            _adacos_infer_kernel,
            out_shape=jax.ShapeDtypeStruct((B_pad, C_pad), jnp.float32),
            grid_spec=pltpu.PrefetchScalarGridSpec(
                num_scalar_prefetch=0,
                grid=(nb, nc),
                in_specs=[x_spec, w_spec],
                out_specs=logits_spec),
            compiler_params=cparams,
        )(x_p, W_p)
        return logits_p[:B, :C]

    label2d = label.astype(jnp.int32).reshape(B, 1)
    label_p = (jnp.pad(label2d, ((0, B_pad - B), (0, 0)))
               if B_pad != B else label2d)
    s_arr = jnp.asarray(s, jnp.float32).reshape(1)

    logits_p, esum_p, tgt_p = pl.pallas_call(
        _adacos_train_kernel,
        out_shape=(jax.ShapeDtypeStruct((B_pad, C_pad), jnp.float32),
                   jax.ShapeDtypeStruct((B_pad, 1), jnp.float32),
                   jax.ShapeDtypeStruct((B_pad, 1), jnp.float32)),
        grid_spec=pltpu.PrefetchScalarGridSpec(
            num_scalar_prefetch=0,
            grid=(nb, nc),
            in_specs=[x_spec, w_spec, col_spec, smem_spec],
            out_specs=(logits_spec, col_spec, col_spec)),
        compiler_params=cparams,
    )(x_p, W_p, label_p, s_arr)

    logits = logits_p[:B, :C]
    esum = esum_p[:B, 0]
    tgt = tgt_p[:B, 0]

    # ---- scalar epilogue (mirrors the torch.no_grad() block) ----------------
    s_old = jnp.asarray(s, jnp.float32)
    # esum includes every padded class exactly once per real row with logit
    # exactly 0.0 (exp(s*0)=1), plus the target class; subtract both.
    bsum = (jnp.sum(esum)
            - jnp.sum(jnp.exp(s_old * tgt))
            - jnp.float32(B * (C_pad - C)))
    B_avg = bsum / B
    theta_t = jnp.arccos(jnp.clip(tgt, -1.0 + 1e-7, 1.0 - 1e-7))
    theta_med = jnp.sort(theta_t)[(B - 1) // 2]   # torch.median -> lower median
    s_new = jnp.log(B_avg) / jnp.cos(
        jnp.minimum(jnp.float32(math.pi / 4.0), theta_med))
    return s_new * logits, s_new


class AdaCos:
    """JAX/Pallas port of the PyTorch AdaCos module (forward pass).

    The adaptive scale `s` is threaded functionally: the training call returns
    (output, new_s) instead of mutating traced Python state (jit-safe).
    """

    def __init__(self, num_features, num_classes, m=0.5, key=None,
                 dtype=jnp.float32):
        self.num_features = num_features
        self.n_classes = num_classes
        self.s = math.sqrt(2.0) * math.log(num_classes - 1)
        self.m = m                                  # unused, kept for parity
        key = jax.random.PRNGKey(0) if key is None else key
        # xavier_uniform_ on a (num_classes, num_features) weight:
        bound = math.sqrt(6.0 / (num_features + num_classes))
        self.W = jax.random.uniform(
            key, (num_classes, num_features), jnp.float32, -bound, bound
        ).astype(dtype)

    def __call__(self, x, label=None, s=None, **tile_kwargs):
        s = self.s if s is None else s
        if label is None:
            return adacos_forward(x, self.W, s, None, **tile_kwargs)
        return adacos_forward(x, self.W, s, label, **tile_kwargs)


# ----------------------------------------------------------------------------
# pure-JAX reference + demo
# ----------------------------------------------------------------------------

def _reference(x, W, s, label):
    eps = 1e-12
    xn = x / jnp.maximum(jnp.linalg.norm(x, axis=-1, keepdims=True), eps)
    wn = W / jnp.maximum(jnp.linalg.norm(W, axis=-1, keepdims=True), eps)
    logits = xn @ wn.T
    if label is None:
        return logits, s
    theta = jnp.arccos(jnp.clip(logits, -1.0 + 1e-7, 1.0 - 1e-7))
    one_hot = jax.nn.one_hot(label, W.shape[0], dtype=logits.dtype)
    B_avg = jnp.sum(jnp.where(one_hot < 1, jnp.exp(s * logits), 0.0)) / x.shape[0]
    theta_med = jnp.sort(theta[one_hot == 1])[(x.shape[0] - 1) // 2]
    s_new = jnp.log(B_avg) / jnp.cos(jnp.minimum(jnp.float32(math.pi / 4), theta_med))
    return s_new * logits, s_new


if __name__ == "__main__":
    # Deliberately non-multiples of the tile sizes: exercises B/C padding,
    # multi-tile class accumulation, and the padded-class correction.
    B, F_, C = 10, 256, 300

    key = jax.random.PRNGKey(0)
    kx, kw, kl = jax.random.split(key, 3)
    x = jax.random.normal(kx, (B, F_), jnp.float32)
    label = jax.random.randint(kl, (B,), 0, C)

    model = AdaCos(num_features=F_, num_classes=C, key=kw)
    s0 = model.s

    # inference path (label=None): plain cosine logits (explicit small tiles
    # so the multi-tile grid + accumulators are exercised even at demo shapes)
    logits_infer = model(x, block_b=8, block_c=128)
    # same path with auto-selected tiles
    logits_auto = model(x)
    # training path (label given): adaptively-scaled logits + new scale
    out_train, s_new = model(x, label, block_b=8, block_c=128)
    jax.block_until_ready((logits_infer, logits_auto, out_train, s_new))

    # sanity check against a pure-JAX reference
    ref_logits, _ = _reference(x, model.W, s0, None)
    ref_out, ref_s = _reference(x, model.W, s0, label)
    assert jnp.allclose(logits_infer, ref_logits, atol=1e-2, rtol=1e-2)
    assert jnp.allclose(logits_auto, ref_logits, atol=1e-2, rtol=1e-2)
    assert jnp.allclose(out_train, ref_out, atol=1e-2, rtol=1e-2)
    assert jnp.allclose(s_new, ref_s, atol=1e-2, rtol=1e-2)

    print("KERNEL_OK")
</pallas_src>

<mosaic_0001>
module attributes {stable_mosaic.version = 11 : i64} {
  func.func @_adacos_infer_kernel(%arg0: i32, %arg1: i32, %arg2: memref<8x256xf32, #tpu.memory_space<vmem>>, %arg3: memref<128x256xf32, #tpu.memory_space<vmem>>, %arg4: memref<8x128xf32, #tpu.memory_space<vmem>>) attributes {dimension_semantics = [#tpu.dimension_semantics<parallel>, #tpu.dimension_semantics<arbitrary>], iteration_bounds = array<i64: 2, 3>, scalar_prefetch = 0 : i64, scratch_operands = 0 : i64, tpu.core_type = #tpu.core_type<tc>, window_params = [{transform_indices = @transform_0, window_bounds = array<i64: 8, 256>}, {transform_indices = @transform_1, window_bounds = array<i64: 128, 256>}, {transform_indices = @transform_2, window_bounds = array<i64: 8, 128>}]} {
    %c0 = arith.constant 0 : index
    %c0_0 = arith.constant 0 : index
    %0 = vector.load %arg2[%c0, %c0_0] : memref<8x256xf32, #tpu.memory_space<vmem>>, vector<8x256xf32>
    %c0_1 = arith.constant 0 : index
    %c0_2 = arith.constant 0 : index
    %1 = vector.load %arg3[%c0_1, %c0_2] : memref<128x256xf32, #tpu.memory_space<vmem>>, vector<128x256xf32>
    %cst = arith.constant dense<0.000000e+00> : vector<8x128xf32>
    %2 = tpu.matmul %0, %1, %cst {dimension_numbers = #tpu.dot_dimension_numbers<[1], [1], [0], [0], [0, 0, 1, 0], [], []>} : vector<8x256xf32>, vector<128x256xf32>, vector<8x128xf32> -> vector<8x128xf32>
    %3 = arith.mulf %0, %0 : vector<8x256xf32>
    %cst_3 = arith.constant dense<0.000000e+00> : vector<8xf32>
    %4 = vector.multi_reduction <add>, %3, %cst_3 [1] : vector<8x256xf32> to vector<8xf32>
    %5 = vector.shape_cast %4 : vector<8xf32> to vector<8x1xf32>
    %cst_4 = arith.constant 1.000000e-24 : f32
    %6 = vector.broadcast %cst_4 : f32 to vector<8x1xf32>
    %7 = arith.maximumf %5, %6 : vector<8x1xf32>
    %8 = math.rsqrt %7 : vector<8x1xf32>
    %9 = arith.mulf %1, %1 : vector<128x256xf32>
    %cst_5 = arith.constant dense<0.000000e+00> : vector<128xf32>
    %10 = vector.multi_reduction <add>, %9, %cst_5 [1] : vector<128x256xf32> to vector<128xf32>
    %cst_6 = arith.constant 1.000000e-24 : f32
    %11 = vector.broadcast %cst_6 : f32 to vector<128xf32>
    %12 = arith.maximumf %10, %11 : vector<128xf32>
    %13 = math.rsqrt %12 : vector<128xf32>
    %14 = vector.broadcast %8 : vector<8x1xf32> to vector<8x128xf32>
    %15 = arith.mulf %2, %14 : vector<8x128xf32>
    %16 = vector.shape_cast %13 : vector<128xf32> to vector<1x128xf32>
    %17 = vector.broadcast %16 : vector<1x128xf32> to vector<8x128xf32>
    %18 = arith.mulf %15, %17 : vector<8x128xf32>
    %c0_7 = arith.constant 0 : index
    %c0_8 = arith.constant 0 : index
    %19 = vector.load %arg4[%c0_7, %c0_8] : memref<8x128xf32, #tpu.memory_space<vmem>>, vector<8x128xf32>
    tpu.vector_store %arg4[%c0_7, %c0_8], %18 {strides = array<i32>} : memref<8x128xf32, #tpu.memory_space<vmem>>, vector<8x128xf32>,
    return
  }
  func.func @transform_0(%arg0: i32, %arg1: i32) -> (i32, i32) {
    %c0_i32 = arith.constant 0 : i32
    %c0_i32_0 = arith.constant 0 : i32
    return %arg0, %c0_i32 : i32, i32
  }
  func.func @transform_1(%arg0: i32, %arg1: i32) -> (i32, i32) {
    %c0_i32 = arith.constant 0 : i32
    %c0_i32_0 = arith.constant 0 : i32
    return %arg1, %c0_i32 : i32, i32
  }
  func.func @transform_2(%arg0: i32, %arg1: i32) -> (i32, i32) {
    %c0_i32 = arith.constant 0 : i32
    return %arg0, %arg1 : i32, i32
  }
}

</mosaic_0001>

<bundles_post_ra>
// kernel: tpu_custom_call.1
= control target key start
LH: loop header
LB: loop body
LE: loop exit
PB: predicated region body
PF: predicated region fallthrough
CT: control target
= control target key end

     0   :  { %s1941_s0 = inlined_call_operand.hbm [shape: f32[16,256], index: 0, kind: input, shape index: {}]   ;;  %s1942_s1 = inlined_call_operand.hbm [shape: f32[384,256], index: 1, kind: input, shape index: {}]   ;;  %s1943_s2 = inlined_call_operand.hbm [shape: f32[16,384], index: 2, kind: output, shape index: {}]  }
   0x1   :  { %1955 = sst [smem:[#allocation19_spill]] %s1941_s0 }
   0x2   :  { %1956 = sst [smem:[#allocation20_spill]] %s1943_s2 }
   0x3   :  { %7 = vsyncpa [#allocation3], 0 }
   0x4   :  { %9 = vsyncpa [#allocation3 + $0x1], 0 }
   0x5   :  { %10 = vsyncpa [#allocation6], 0 }
   0x6   :  { %12 = vsyncpa [#allocation6 + $0x1], 0 }
   0x7   :  { %13 = vsyncpa [#allocation4], 0 }
   0x8   :  { %15 = vsyncpa [#allocation4 + $0x1], 0  ;;  %s1204_s9 = smov 0   ;;  %s1206_s10 = smov 0  }
   0x9   :  { %s1208_s11 = smov 0   ;;  %s1210_s12 = smov 0  }
   0xa   :  { %s1212_s13 = smov 0   ;;  %s1214_s14 = smov 0  }
   0xb   :  { %s1216_s15 = smov 0   ;;  %s1218_s16 = smov 0  }
   0xc   :  { %s1220_s17 = smov 0   ;;  %s1222_s18 = smov 0  }
   0xd   :  { %s1224_s19 = smov 0   ;;  %s1226_s20 = smov 0  }
   0xe   :  { %s1228_s21 = smov 0   ;;  %s1230_s22 = smov 0  }
   0xf LB: > { %1957 = sst [smem:[#allocation11_spill]] %s1133_s9  ;;  %s785_s23 = sadd.s32 4294967295, %s1185_s22   ;;  %s1185_s22 = sphi %s1230_s22, %s21_s22   ;;  %s1181_s21 = sphi %s1228_s21, %s2023_s21   ;;  %s1177_s20 = sphi %s1226_s20, %s2013_s20   ;;  %s1173_s19 = sphi %s1224_s19, %s2022_s19   ;;  %s1169_s18 = sphi %s1222_s18, %s2012_s18   ;;  %s1165_s17 = sphi %s1220_s17, %s2021_s17   ;;  %s1161_s16 = sphi %s1218_s16, %s2020_s16   ;;  %s1157_s15 = sphi %s1216_s15, %s2019_s15   ;;  %s1153_s14 = sphi %s1214_s14, %s2018_s14   ;;  %s1149_s13 = sphi %s1212_s13, %s2017_s13   ;;  %s1145_s12 = sphi %s1210_s12, %s2016_s12   ;;  %s1141_s11 = sphi %s1208_s11, %s2015_s11   ;;  %s1137_s10 = sphi %s1206_s10, %s2014_s10   ;;  %s1133_s9 = sphi %s1204_s9, %s2010_s9  }
  0x10   : > { %1958 = sst [smem:[#allocation12_spill]] %s1137_s10  ;;  %s786_s24 = sadd.s32 4294967294, %s1185_s22  }
  0x11   : > { %1959 = sst [smem:[#allocation13_spill]] %s1169_s18  ;;  %p47_p0 = scmp.ne.s32.totalorder %s1165_s17, %s1161_s16 }
  0x12   : > { %1960 = sst [smem:[#allocation14_spill]] %s1177_s20  ;;  %p48_p1 = scmp.eq.s32.totalorder %s1185_s22, 0 }
  0x13   : > { %1961 = sst [smem:[#allocation15_spill]] %s1185_s22  ;;  %p53_p2 = scmp.ne.s32.totalorder %s1161_s16, %s1157_s15 }
  0x14   : > { %p54_p3 = scmp.eq.s32.totalorder %s785_s23, 0  ;;  %p1278_p4 = por %p48_p1, %p47_p0 }
  0x15   : > { %p73_p5 = scmp.ne.s32.totalorder %s1153_s14, %s1149_s13  ;;  %p79_p7 = scmp.ne.s32.totalorder %s1149_s13, %s1145_s12 }
  0x16   : > { %p1284_p6 = por %p54_p3, %p53_p2  ;;  %p104_p9 = scmp.ne.s32.totalorder %s1141_s11, %s1137_s10 }
  0x17   : > { %p1289_p8 = por %p73_p5, %p48_p1  ;;  %p1295_p10 = por %p79_p7, %p54_p3 }
  0x18   : > { %p105_p11 = scmp.eq.s32.totalorder %s785_s23, 5  ;;  %p110_p12 = scmp.ne.s32.totalorder %s1137_s10, %s1133_s9 }
  0x19   : > { %p111_p13 = scmp.eq.s32.totalorder %s786_s24, 5  ;;  %p825_p2 = scmp.lt.s32.totalorder %s1185_s22, 6 }
  0x1a   : > { %p1301_p0 = por %p105_p11, %p104_p9  ;;  %s131_s5 = sand.u32 1, %s1165_s17  }
  0x1b   : > { %p1305_p1 = por %p111_p13, %p110_p12  ;;  %s804_s6 = sshll.u32 %s1181_s21, 4 }
  0x1c   : > { %s1966_s3 = scalar_select %p1301_p0, 1, 0 }
  0x1d   : > { %s1968_s4 = scalar_select %p1305_p1, 1, 0 }
  0x1e   : > { %1967 = sst [smem:[#allocation16_spill]] %s1966_s3  ;;  %s789_s7 = sshll.u32 %s131_s5, 4 }
  0x1f   : > { %1969 = sst [smem:[#allocation17_spill]] %s1968_s4  ;;  %s135_s24 = scalar_lea.vmem [#allocation2], %s789_s7 }
  0x20   : > { %s1970_s0 = sld [smem:[#allocation19_spill]]  ;;  %s144_s26 = sshll.u32 %s135_s24, 4  ;;  %s145_s26 = int_to_ptr.vmem [resolvable:$true] %s144_s26 }
  0x21   : > { %p815_p3 = pnand %p825_p2, %p1278_p4  ;;  %p1319_p5 = pnand %p825_p2, %p1289_p8 }
  0x22   : > { %p796_p7 = scmp.ge.s32.totalorder %s1185_s22, 1  ;;  %p172_p9 = scmp.lt.s32.totalorder %s1185_s22, 7 }
  0x23   : > { %s66_s8 = sadd.s32 1, %s1153_s14  ;;  %s30_s27 = sadd.s32 1, %s1177_s20 }
  0x24   : > { %p1325_p11 = pnand %p796_p7, %p172_p9  ;;  %s94_s12 = sadd.s32 1, %s1141_s11 }
  0x25   : > { %p31_p4 = scmp.ge.s32.totalorder %s30_s27, 3  ;;  %s151_s29 = sand.u32 1, %s1153_s14  }
  0x26   : > { %s140_s15 = scalar_lea.hbm %s1970_s0, %s804_s6  ;;  %s132_s6 = scalar_lea.sflag [#allocation3], %s131_s5 }
  0x27   : > { %s142_s23 = sshll.u32 %s140_s15, 4  ;;  %s792_s15 = sshll.u32 %s151_s29, 8  ;;  %s143_s23 = int_to_ptr.hbm [resolvable:$true] %s142_s23 }
  0x28   : > { %817 = dma.hbm_to_vmem [thread:$0]  (!%p815_p3), %s143_s23, 256, %s145_s26, %s132_s6  }
  0x29   : > { %s2025_s27 = smov (%p31_p4, %s30_s27), 0  ;;  %s1974_s24 = sadd.s32 1, %s1181_s21 }
  0x2a   : > { %1973 = sst [smem:[#allocation18_spill]] %s2025_s27  ;;  %s2027_s24 = smov (!%p31_p4, %s1974_s24), %s1181_s21 }
  0x2b   : > { %s63_s26 = ssub.s32 %s1177_s20, %s2025_s27  ;;  %p35_p8 = scmp.ge.s32.totalorder %s2027_s24, 2 }
  0x2c   : > { %p64_p12 = scmp.eq.s32.totalorder %s63_s26, 0  ;;  %s806_s5 = sshll.u32 %s1177_s20, 8 }
  0x2d   : > { %s155_s23 = scalar_lea.vmem [#allocation5], %s792_s15  ;;  %s2029_s24 = smov (%p35_p8, %s2027_s24), 0 }
  0x2e   : > { %s164_s6 = sshll.u32 %s155_s23, 4  ;;  %s37_s4 = ssub.s32 %s1181_s21, %s2029_s24  ;;  %s165_s6 = int_to_ptr.vmem [resolvable:$true] %s164_s6 }
  0x2f   : > { %s1344_s0 = scalar_select %p64_p12, %s1153_s14, %s66_s8  }
  0x30   : > { %s161_s3 = scalar_lea.hbm %s1942_s1, %s806_s5  ;;  %p38_p13 = scmp.eq.s32.totalorder %s37_s4, 0 }
  0x31   : > { %s91_s2 = sor.u32 %s63_s26, %s37_s4  ;;  %s162_s27 = sshll.u32 %s161_s3, 4  ;;  %s163_s27 = int_to_ptr.hbm [resolvable:$true] %s162_s27 }
  0x32   : > { %p92_p2 = scmp.eq.s32.totalorder %s91_s2, 0  ;;  %s1975_s18 = sadd.s32 1, %s1165_s17 }
  0x33   : > { %s1354_s10 = scalar_select %p38_p13, %s1165_s17, %s1975_s18  }
  0x34   : > { %s1357_s15 = scalar_select %p92_p2, %s1141_s11, %s94_s12  }
  0x35   : > { %s152_s23 = scalar_lea.sflag [#allocation6], %s151_s29  ;;  %s1187_s20 = smov 256  }
  0x36   : > { %s1188_s8 = smov 16   ;;  %176 = sbr.rel (%p1325_p11) target bundleno = 264 (0x108), region = 28 }
  0x37   : > { %820 = dma.hbm_to_vmem [thread:$0]  (!%p1319_p5), %s163_s27, 4096, %s165_s6, %s152_s23, %s1187_s20, %s1187_s20, %s1188_s8  }
  0x38   : > { %s178_s9 = sand.u32 (!%p1325_p11), 1, %s1161_s16  }
  0x39   : > { %s1364_s2 = sshll.u32 (!%p1325_p11), %s178_s9, 4  ;;  %s179_s18 = scalar_lea.sflag (!%p1325_p11), [#allocation3], %s178_s9 }
  0x3a   : > { %s182_s22 = scalar_lea.vmem (!%p1325_p11), [#allocation2], %s1364_s2 }
  0x3b   : > { %1120 = dma.done.wait (%p1284_p6), %s179_s18, 256  }
  0x3c   : > { %1122 = vsyncadd (%p1284_p6), %s179_s18, 4294967040  ;;  %s188_s25 = sand.u32 1, %s1149_s13  }
  0x3d   : > { %s798_s20 = sshll.u32 %s188_s25, 8  ;;  %s189_s3 = scalar_lea.sflag [#allocation6], %s188_s25 }
  0x3e   : > { %s1372_s4 = scalar_lea.vmem [#allocation5], %s798_s20 }
  0x3f   : > { %1124 = dma.done.wait (%p1295_p10), %s189_s3, 4096  }
  0x40   : > { %1126 = vsyncadd (%p1295_p10), %s189_s3, 4294963200  ;;  %v1379_v0 = vld [vmem:[%s1372_s4 + $0xf0] sm:$0xff]  ;;  %v1382_v1 = vld [vmem:[%s1372_s4 + $0xf8] sm:$0xff]  ;;  %vm588_vm4 = vcmask 130112   ;;  %vm592_vm7 = vcmask 195712   ;;  %vm596_vm15 = vcmask 261312  }
  0x41   : > { %v1385_v2 = vld [vmem:[%s1372_s4 + $0xe0] sm:$0xff]  ;;  %254 = vmatpush.xpose.msra.mxu0 %v1379_v0  ;;  %274 = vmatpush.xpose.msra.mxu1 %v1382_v1  ;;  %v1390_v3 = vld [vmem:[%s1372_s4 + $0xe8] sm:$0xff]  ;;  %v1423_v17 = vld [vmem:[%s1372_s4 + $0xd0] sm:$0xff]  ;;  %s807_s28 = smul.u32 3, %s1173_s19  ;;  %s1998_s30 = sld [smem:[#allocation12_spill]] }
  0x42   : > { %v1393_v4 = vld [vmem:[%s1372_s4 + $0x20] sm:$0xff]  ;;  %v1396_v5 = vld [vmem:[%s1372_s4 + $0x28] sm:$0xff]  ;;  %v1426_v18 = vld [vmem:[%s1372_s4 + $0x30] sm:$0xff]  ;;  %s1999_s7 = sld [smem:[#allocation13_spill]] }
  0x43   : > { %v314_v6 = vmul.f32 %v1393_v4, %v1393_v4  ;;  %v315_v7 = vmul.f32 %v1396_v5, %v1396_v5  ;;  %v1403_v8 = vld [vmem:[%s1372_s4] sm:$0xff]  ;;  %v1406_v9 = vld [vmem:[%s1372_s4 + $0x8] sm:$0xff]  ;;  %v1431_v20 = vld [vmem:[%s1372_s4 + $0x38] sm:$0xff]  ;;  %v316_v25 = vmul.f32 %v1426_v18, %v1426_v18  ;;  %s2004_s6 = sld [smem:[#allocation20_spill]] }
  0x44   : > { %v1409_v10 = vld [vmem:[%s1372_s4 + $0x40] sm:$0xff]  ;;  %v310_v11 = vmul.f32 %v1403_v8, %v1403_v8  ;;  %v311_v12 = vmul.f32 %v1406_v9, %v1406_v9  ;;  %v1416_v13 = vld [vmem:[%s1372_s4 + $0x48] sm:$0xff]  ;;  %v1434_v21 = vld [vmem:[%s1372_s4 + $0x10] sm:$0xff]  ;;  %v317_v26 = vmul.f32 %v1431_v20, %v1431_v20 }
  0x45   : > { %v318_v14 = vmul.f32 %v1409_v10, %v1409_v10  ;;  %v348_v15 = vadd.f32 %v315_v7, %v314_v6  ;;  %v319_v16 = vmul.f32 %v1416_v13, %v1416_v13  ;;  %255 = vmatpush.xpose.msra.mxu0 %v1385_v2  ;;  %275 = vmatpush.xpose.msra.mxu1 %v1390_v3  ;;  %v1437_v22 = vld [vmem:[%s1372_s4 + $0x18] sm:$0xff]  ;;  %v1447_v27 = vld [vmem:[%s1372_s4 + $0x50] sm:$0xff]  ;;  %v246_v33 = vld [vmem:[%s1372_s4 + $0xc0] sm:$0xff] }
  0x46   : > { %v342_v19 = vadd.f32 %v311_v12, %v310_v11  ;;  %v1440_v24 = vld [vmem:[%s1372_s4 + $0xd8] sm:$0xff]  ;;  %v312_v29 = vmul.f32 %v1434_v21, %v1434_v21  ;;  %v313_v30 = vmul.f32 %v1437_v22, %v1437_v22  ;;  %v320_v31 = vmul.f32 %v1447_v27, %v1447_v27  ;;  %v247_v34 = vld [vmem:[%s1372_s4 + $0xc8] sm:$0xff]  ;;  %v236_v37 = vld [vmem:[%s1372_s4 + $0x70] sm:$0xff] }
  0x47   : > { %349 = vadd.xlane.f32.xlu1 %v348_v15  ;;  %v354_v23 = vadd.f32 %v319_v16, %v318_v14  ;;  %v1450_v28 = vld [vmem:[%s1372_s4 + $0x58] sm:$0xff]  ;;  %v351_v35 = vadd.f32 %v317_v26, %v316_v25  ;;  %v234_v40 = vld [vmem:[%s1372_s4 + $0x60] sm:$0xff]  ;;  %v235_v41 = vld [vmem:[%s1372_s4 + $0x68] sm:$0xff]  ;;  %v324_v46 = vmul.f32 %v236_v37, %v236_v37  ;;  %v336_v14 = vmul.f32 %v1423_v17, %v1423_v17  ;;  %s216_s19 = sand.u32 1, %s1998_s30  }
  0x48   : > { %343 = vadd.xlane.f32.xlu0 %v342_v19  ;;  %v321_v32 = vmul.f32 %v1450_v28, %v1450_v28  ;;  %v345_v36 = vadd.f32 %v313_v30, %v312_v29  ;;  %v237_v38 = vld [vmem:[%s1372_s4 + $0x78] sm:$0xff]  ;;  %v238_v42 = vld [vmem:[%s1372_s4 + $0x80] sm:$0xff]  ;;  %v239_v43 = vld [vmem:[%s1372_s4 + $0x88] sm:$0xff]  ;;  %v322_v48 = vmul.f32 %v234_v40, %v234_v40  ;;  %v323_v49 = vmul.f32 %v235_v41, %v235_v41  ;;  %s672_s27 = sadd.s32 %s1999_s7, %s807_s28  ;;  %s1867_s12 = sshll.u32 %s216_s19, 3 }
  0x49   : > { %355 = vadd.xlane.f32.xlu2 %v354_v23  ;;  %256 = vmatpush.xpose.msra.mxu0 %v1423_v17  ;;  %v244_v44 = vld [vmem:[%s1372_s4 + $0xb0] sm:$0xff]  ;;  %v245_v45 = vld [vmem:[%s1372_s4 + $0xb8] sm:$0xff]  ;;  %v325_v47 = vmul.f32 %v237_v38, %v237_v38  ;;  %v326_v50 = vmul.f32 %v238_v42, %v238_v42  ;;  %v327_v51 = vmul.f32 %v239_v43, %v239_v43  ;;  %v242_v52 = vld [vmem:[%s1372_s4 + $0xa0] sm:$0xff]  ;;  %s801_s29 = sshll.u32 %s672_s27, 3  ;;  %s218_s9 = scalar_lea.vmem [#allocation7], %s1867_s12 }
  0x4a   : > { %276 = vmatpush.xpose.msra.mxu1 %v1440_v24  ;;  %v357_v39 = vadd.f32 %v321_v32, %v320_v31  ;;  %v243_v53 = vld [vmem:[%s1372_s4 + $0xa8] sm:$0xff]  ;;  %v360_v55 = vadd.f32 %v323_v49, %v322_v48  ;;  %v240_v57 = vld [vmem:[%s1372_s4 + $0x90] sm:$0xff]  ;;  %v241_v58 = vld [vmem:[%s1372_s4 + $0x98] sm:$0xff]  ;;  %v330_v59 = vmul.f32 %v242_v52, %v242_v52  ;;  %v332_v63 = vmul.f32 %v244_v44, %v244_v44  ;;  %s674_s23 = scalar_lea.hbm %s2004_s6, %s801_s29  ;;  %s676_s2 = sshll.u32 %s218_s9, 4  ;;  %s677_s2 = int_to_ptr.vmem [resolvable:$true] %s676_s2 }
  0x4b   : > { %v363_v54 = vadd.f32 %v325_v47, %v324_v46  ;;  %v366_v56 = vadd.f32 %v327_v51, %v326_v50  ;;  %v331_v60 = vmul.f32 %v243_v53, %v243_v53  ;;  %v328_v61 = vmul.f32 %v240_v57, %v240_v57  ;;  %v220_v17 = vld [vmem:[%s182_s22] sm:$0xff]  ;;  %v221_v30 = vld [vmem:[%s182_s22 + $0x8] sm:$0xff]  ;;  %s678_s18 = sshll.u32 %s674_s23, 4  ;;  %s662_s22 = scalar_lea.sflag [#allocation4], %s216_s19  ;;  %s679_s18 = int_to_ptr.hbm [resolvable:$true] %s678_s18 }
  0x4c   : > { %v329_v62 = vmul.f32 %v241_v58, %v241_v58  ;;  %v333_v6 = vmul.f32 %v245_v45, %v245_v45  ;;  %v337_v15 = vmul.f32 %v1440_v24, %v1440_v24  ;;  %v334_v16 = vmul.f32 %v246_v33, %v246_v33  ;;  %s1049_s25 = sshra.s32 %s679_s18, 4  ;;  %s1055_s28 = scalar_lea.hbm %s2004_s6, 48  ;;  %s1050_s25 = int_to_ptr.hbm [resolvable:$true] %s1049_s25 }
  0x4d   : > { %257 = vmatpush.xpose.msra.mxu0 %v246_v33  ;;  %v372_v7 = vadd.f32 %v331_v60, %v330_v59  ;;  %v335_v19 = vmul.f32 %v247_v34, %v247_v34  ;;  %v338_v23 = vmul.f32 %v1385_v2, %v1385_v2  ;;  %v339_v25 = vmul.f32 %v1390_v3, %v1390_v3  ;;  %s1051_s20 = scalar_lea.hbm %s1050_s25, 8  ;;  %p1056_p5 = scmp.lt.s32.totalorder %s1050_s25, %s2004_s6 }
  0x4e   : > { %277 = vmatpush.xpose.msra.mxu1 %v247_v34  ;;  %v369_v11 = vadd.f32 %v329_v62, %v328_v61  ;;  %v375_v12 = vadd.f32 %v333_v6, %v332_v63  ;;  %v381_v26 = vadd.f32 %v337_v15, %v336_v14  ;;  %v294_v31 = vmul.f32 %v220_v17, %v220_v17  ;;  %p1052_p6 = scmp.ne.s32.totalorder %s1050_s25, %s1051_s20  ;;  %p1057_p7 = scmp.lt.s32.totalorder %s1055_s28, %s1051_s20 }
  0x4f   : > { %352 = vadd.xlane.f32.xlu1 %v351_v35  ;;  %v378_v29 = vadd.f32 %v335_v19, %v334_v16  ;;  %v384_v24 = vadd.f32 %v339_v25, %v338_v23  ;;  %v295_v32 = vmul.f32 %v221_v30, %v221_v30  ;;  %v340_v2 = vmul.f32 %v1379_v0, %v1379_v0 }
  0x50   : > { %346 = vadd.xlane.f32.xlu0 %v345_v36  ;;  %v341_v3 = vmul.f32 %v1382_v1, %v1382_v1  ;;  %p1053_p10 = pnand %p1052_p6, %p1301_p0  ;;  %p1058_p9 = por %p1057_p7, %p1056_p5 }
  0x51   : > { %358 = vadd.xlane.f32.xlu2 %v357_v39  ;;  %258 = vmatpush.xpose.msra.mxu0 %v244_v44  ;;  %v296_v33 = vadd.f32 %v295_v32, %v294_v31 }
  0x52   : > { %278 = vmatpush.xpose.msra.mxu1 %v245_v45  ;;  %v387_v34 = vadd.f32 %v341_v3, %v340_v2  ;;  %p1054_p3 = pneg %p1053_p10 }
  0x54   : > { %p1059_p11 = pnand %p1058_p9, %p1054_p3 }
  0x55   : > { %259 = vmatpush.xpose.msra.mxu0 %v242_v52 }
  0x56   : > { %279 = vmatpush.xpose.msra.mxu1 %v243_v53 }
  0x57   : > { %364 = vadd.xlane.f32.xlu1 %v363_v54 }
  0x58   : > { %361 = vadd.xlane.f32.xlu0 %v360_v55 }
  0x59   : > { %367 = vadd.xlane.f32.xlu2 %v366_v56  ;;  %260 = vmatpush.xpose.msra.mxu0 %v240_v57 }
  0x5a   : > { %280 = vmatpush.xpose.msra.mxu1 %v241_v58 }
  0x5d   : > { %261 = vmatpush.xpose.msra.mxu0 %v238_v42 }
  0x5e   : > { %281 = vmatpush.xpose.msra.mxu1 %v239_v43 }
  0x5f   : > { %373 = vadd.xlane.f32.xlu1 %v372_v7 }
  0x60   : > { %370 = vadd.xlane.f32.xlu0 %v369_v11 }
  0x61   : > { %376 = vadd.xlane.f32.xlu2 %v375_v12  ;;  %262 = vmatpush.xpose.msra.mxu0 %v236_v37 }
  0x62   : > { %282 = vmatpush.xpose.msra.mxu1 %v237_v38 }
  0x65   : > { %263 = vmatpush.xpose.msra.mxu0 %v234_v40 }
  0x66   : > { %283 = vmatpush.xpose.msra.mxu1 %v235_v41 }
  0x67   : > { %382 = vadd.xlane.f32.xlu1 %v381_v26 }
  0x68   : > { %379 = vadd.xlane.f32.xlu0 %v378_v29 }
  0x69   : > { %385 = vadd.xlane.f32.xlu2 %v384_v24  ;;  %264 = vmatpush.xpose.msra.mxu0 %v1447_v27 }
  0x6a   : > { %284 = vmatpush.xpose.msra.mxu1 %v1450_v28 }
  0x6d   : > { %265 = vmatpush.xpose.msra.mxu0 %v1409_v10 }
  0x6e   : > { %285 = vmatpush.xpose.msra.mxu1 %v1416_v13 }
  0x6f   : > { %297 = vadd.xlane.f32.xlu1 %v296_v33 }
  0x70   : > { %388 = vadd.xlane.f32.xlu0 %v387_v34 }
  0x71   : > { %266 = vmatpush.xpose.msra.mxu0 %v1426_v18 }
  0x72   : > { %286 = vmatpush.xpose.msra.mxu1 %v1431_v20 }
  0x75   : > { %267 = vmatpush.xpose.msra.mxu0 %v1393_v4 }
  0x76   : > { %287 = vmatpush.xpose.msra.mxu1 %v1396_v5 }
  0x79   : > { %268 = vmatpush.xpose.msra.mxu0 %v1434_v21 }
  0x7a   : > { %288 = vmatpush.xpose.msra.mxu1 %v1437_v22 }
  0x7d   : > { %269 = vmatpush.xpose.msra.mxu0 %v1403_v8 }
  0x7e   : > { %289 = vmatpush.xpose.msra.mxu1 %v1406_v9  ;;  %v583_v9 = vlaneseq }
  0x80   : > { %270 = vmatmul.f32.vlgmr.msra.gmra.mxu0 %v220_v17  ;;  %v1530_v39 = vand.u32 127, %v583_v9 }
  0x81   : > { %290 = vmatmul.f32.vlgmr.msra.gmra.mxu1 %v221_v30 }
  0x82   : > { %v1541_v47 = vadd.s32 4294967280, %v1530_v39  ;;  %v1549_v52 = vadd.s32 4294967264, %v1530_v39  ;;  %v1552_v53 = vadd.s32 4294967272, %v1530_v39  ;;  %v586_v55 = vadd.s32 4294967288, %v1530_v39 }
  0x83   : > { %v1561_v58 = vadd.s32 4294967256, %v1530_v39  ;;  %v1570_v7 = vadd.s32 4294967240, %v1530_v39  ;;  %v1602_v34 = vadd.s32 4294967248, %v1530_v39 }
  0xba   : > { %v350_v0 = vpop.xlane.xlu1 %349 }
  0xbb   : > { %v1504_v1 = vmax.f32 %v350_v0, 1e-24  ;;  %v344_v10 = vpop.xlane.xlu0 %343 }
  0xbc   : > { %v1506_v13 = vmax.f32 %v344_v10, 1e-24  ;;  %v356_v18 = vpop.xlane.xlu2 %355 }
  0xbd   : > { %941 = vrsqrt.f32 %v1504_v1  ;;  %v1509_v4 = vmax.f32 %v356_v18, 1e-24  ;;  %vm432_vm0 = vweird.f32 %v1504_v1 }
  0xbe   : > { %943 = vrsqrt.f32 %v1506_v13  ;;  %vm412_vm1 = vweird.f32 %v1506_v13 }
  0xbf   : > { %945 = vrsqrt.f32 %v1509_v4  ;;  %vm452_vm3 = vweird.f32 %v1509_v4 }
  0xc2   : > { %v353_v5 = vpop.xlane.xlu1 %352 }
  0xc3   : > { %v1513_v8 = vpop.eup %941  ;;  %v1515_v20 = vmax.f32 %v353_v5, 1e-24  ;;  %v347_v21 = vpop.xlane.xlu0 %346 }
  0xc4   : > { %v1517_v22 = vpop.eup %943  ;;  %v427_v27 = vmul.f32 %v1513_v8, %v1504_v1  ;;  %v1521_v28 = vmax.f32 %v347_v21, 1e-24  ;;  %v359_v35 = vpop.xlane.xlu2 %358  ;;  %vm433_vm2 = vweird.f32 %v1513_v8 }
  0xc5   : > { %v1523_v36 = vpop.eup %945  ;;  %v407_v37 = vmul.f32 %v1517_v22, %v1506_v13  ;;  %947 = vrsqrt.f32 %v1515_v20  ;;  %v1535_v42 = vmax.f32 %v359_v35, 1e-24  ;;  %vm413_vm5 = vweird.f32 %v1517_v22  ;;  %vm1595_vm9 = vmor %vm432_vm0, %vm433_vm2 }
  0xc6   : > { %v428_v38 = vmul.f32 %v1513_v8, %v427_v27  ;;  %949 = vrsqrt.f32 %v1521_v28  ;;  %v447_v41 = vmul.f32 %v1523_v36, %v1509_v4  ;;  %vm422_vm6 = vweird.f32 %v1521_v28  ;;  %vm1608_vm10 = vmor %vm412_vm1, %vm413_vm5 }
  0xc7   : > { %v408_v40 = vmul.f32 %v1517_v22, %v407_v37  ;;  %951 = vrsqrt.f32 %v1535_v42  ;;  %vm453_vm11 = vweird.f32 %v1523_v36  ;;  %vm442_vm12 = vweird.f32 %v1515_v20 }
  0xc8   : > { %v429_v43 = vmul.f32 0.5, %v428_v38  ;;  %v448_v48 = vmul.f32 %v1523_v36, %v447_v41  ;;  %vm1646_vm0 = vmor %vm452_vm3, %vm453_vm11  ;;  %vm600_vm1 = vcmask 326912   ;;  %vm462_vm2 = vweird.f32 %v1535_v42 }
  0xc9   : > { %v409_v44 = vmul.f32 0.5, %v408_v40 }
  0xca   : > { %v365_v45 = vpop.xlane.xlu1 %364  ;;  %v430_v59 = vsub.f32 1.5, %v429_v43  ;;  %v449_v63 = vmul.f32 0.5, %v448_v48 }
  0xcb   : > { %v1538_v46 = vpop.eup %947  ;;  %v1544_v49 = vmax.f32 %v365_v45, 1e-24  ;;  %v362_v50 = vpop.xlane.xlu0 %361  ;;  %v410_v60 = vsub.f32 1.5, %v409_v44  ;;  %v1654_v45 = vadd.s32 4294967232, %v1530_v39 }
  0xcc   : > { %v1546_v51 = vpop.eup %949  ;;  %v437_v54 = vmul.f32 %v1538_v46, %v1515_v20  ;;  %v368_v56 = vpop.xlane.xlu2 %367  ;;  %v1572_v11 = vmax.f32 %v362_v50, 1e-24  ;;  %v431_v16 = vmul.f32 %v1513_v8, %v430_v59  ;;  %v450_v17 = vsub.f32 1.5, %v449_v63 }
  0xcd   : > { %v417_v57 = vmul.f32 %v1546_v51, %v1521_v28  ;;  %953 = vrsqrt.f32 %v1544_v49  ;;  %v1566_v62 = vpop.eup %951  ;;  %v411_v19 = vmul.f32 %v1517_v22, %v410_v60  ;;  %v1584_v25 = vmax.f32 %v368_v56, 1e-24 }
  0xce   : > { %v438_v61 = vmul.f32 %v1538_v46, %v437_v54  ;;  %v457_v14 = vmul.f32 %v1566_v62, %v1535_v42  ;;  %955 = vrsqrt.f32 %v1572_v11  ;;  %vm423_vm8 = vweird.f32 %v1546_v51 }
  0xcf   : > { %v418_v6 = vmul.f32 %v1546_v51, %v417_v57  ;;  %957 = vrsqrt.f32 %v1584_v25  ;;  %v415_v10 = vsel %vm1608_vm10, %v1517_v22, %v411_v19  ;;  %vm443_vm13 = vweird.f32 %v1538_v46  ;;  %vm424_vm14 = vmor %vm422_vm6, %vm423_vm8 }
  0xd0   : > { %v439_v12 = vmul.f32 0.5, %v438_v61  ;;  %v458_v23 = vmul.f32 %v1566_v62, %v457_v14  ;;  %v435_v9 = vsel %vm1595_vm9, %v1513_v8, %v431_v16  ;;  %v451_v21 = vmul.f32 %v1523_v36, %v450_v17  ;;  %vm1663_vm3 = vmor %vm442_vm12, %vm443_vm13 }
  0xd1   : > { %v419_v15 = vmul.f32 0.5, %v418_v6  ;;  %v585_v40 = vperm.slane %v415_v10, %v1530_v39  ;;  %vm463_vm5 = vweird.f32 %v1566_v62  ;;  %v591_v50 = vperm.slane %v435_v9, %v1541_v47 }
  0xd2   : > { %v374_v26 = vpop.xlane.xlu1 %373  ;;  %v440_v2 = vsub.f32 1.5, %v439_v12  ;;  %v459_v3 = vmul.f32 0.5, %v458_v23  ;;  %vm482_vm6 = vweird.f32 %v1544_v49  ;;  %v455_v59 = vsel %vm1646_vm0, %v1523_v36, %v451_v21  ;;  %vm1685_vm8 = vmor %vm462_vm2, %vm463_vm5 }
  0xd3   : > { %v1586_v29 = vpop.eup %953  ;;  %v420_v30 = vsub.f32 1.5, %v419_v15  ;;  %v1589_v24 = vmax.f32 %v374_v26, 1e-24  ;;  %v371_v31 = vpop.xlane.xlu0 %370  ;;  %vm472_vm9 = vweird.f32 %v1572_v11  ;;  %vm608_vm10 = vcmask 458112  }
  0xd4   : > { %v477_v33 = vmul.f32 %v1586_v29, %v1544_v49  ;;  %v377_v18 = vpop.xlane.xlu2 %376  ;;  %v1626_v5 = vpop.eup %955  ;;  %v1633_v27 = vmax.f32 %v371_v31, 1e-24  ;;  %v441_v28 = vmul.f32 %v1538_v46, %v440_v2  ;;  %v460_v37 = vsub.f32 1.5, %v459_v3 }
  0xd5   : > { %v421_v1 = vmul.f32 %v1546_v51, %v420_v30  ;;  %959 = vrsqrt.f32 %v1589_v24  ;;  %v467_v38 = vmul.f32 %v1626_v5, %v1572_v11  ;;  %v1640_v43 = vmax.f32 %v377_v18, 1e-24  ;;  %v1656_v48 = vpop.eup %957 }
  0xd6   : > { %v478_v13 = vmul.f32 %v1586_v29, %v477_v33  ;;  %961 = vrsqrt.f32 %v1633_v27  ;;  %v445_v47 = vsel %vm1663_vm3, %v1538_v46, %v441_v28  ;;  %v487_v20 = vmul.f32 %v1656_v48, %v1584_v25 }
  0xd7   : > { %v425_v22 = vsel %vm424_vm14, %v1546_v51, %v421_v1  ;;  %v468_v44 = vmul.f32 %v1626_v5, %v467_v38  ;;  %963 = vrsqrt.f32 %v1640_v43  ;;  %vm473_vm11 = vweird.f32 %v1626_v5 }
  0xd8   : > { %v587_v35 = vperm.slane %v425_v22, %v586_v55  ;;  %v479_v41 = vmul.f32 0.5, %v478_v13  ;;  %v461_v55 = vmul.f32 %v1566_v62, %v460_v37  ;;  %v488_v12 = vmul.f32 %v1656_v48, %v487_v20 }
  0xd9   : > { %v469_v56 = vmul.f32 0.5, %v468_v44  ;;  %v595_v14 = vperm.slane %v445_v47, %v1552_v53  ;;  %vm483_vm12 = vweird.f32 %v1586_v29  ;;  %v599_v1 = vperm.slane %v455_v59, %v1549_v52 }
  0xda   : > { %v589_v51 = vsel %vm588_vm4, %v587_v35, %v585_v40  ;;  %v383_v57 = vpop.xlane.xlu1 %382  ;;  %vm604_vm4 = vcmask 392512   ;;  %v480_v46 = vsub.f32 1.5, %v479_v41  ;;  %v465_v19 = vsel %vm1685_vm8, %v1566_v62, %v461_v55  ;;  %vm1737_vm0 = vmor %vm482_vm6, %vm483_vm12 }
  0xdb   : > { %v1670_v54 = vpop.eup %959  ;;  %v380_v63 = vpop.xlane.xlu0 %379  ;;  %v593_v6 = vsel %vm592_vm7, %v591_v50, %v589_v51  ;;  %v470_v36 = vsub.f32 1.5, %v469_v56  ;;  %v1700_v16 = vmax.f32 %v383_v57, 1e-24  ;;  %v489_v26 = vmul.f32 0.5, %v488_v12  ;;  %vm1714_vm7 = vmor %vm472_vm9, %vm473_vm11 }
  0xdc   : > { %v507_v61 = vmul.f32 %v1670_v54, %v1589_v24  ;;  %v1695_v42 = vpop.eup %961  ;;  %v597_v53 = vsel %vm596_vm15, %v595_v14, %v593_v6  ;;  %v481_v31 = vmul.f32 %v1586_v29, %v480_v46  ;;  %vm612_vm13 = vcmask 523712  }
  0xdd   : > { %v471_v23 = vmul.f32 %v1626_v5, %v470_v36  ;;  %v497_v17 = vmul.f32 %v1695_v42, %v1633_v27  ;;  %v1708_v30 = vpop.eup %963  ;;  %965 = vrsqrt.f32 %v1700_v16  ;;  %v490_v3 = vsub.f32 1.5, %v489_v26 }
  0xde   : > { %v508_v15 = vmul.f32 %v1670_v54, %v507_v61  ;;  %v517_v0 = vmul.f32 %v1708_v30, %v1640_v43  ;;  %vm492_vm14 = vweird.f32 %v1584_v25  ;;  %v1727_v11 = vmax.f32 %v380_v63, 1e-24 }
  0xdf   : > { %v475_v62 = vsel %vm1714_vm7, %v1626_v5, %v471_v23  ;;  %v498_v33 = vmul.f32 %v1695_v42, %v497_v17  ;;  %v603_v10 = vperm.slane %v465_v19, %v1561_v58  ;;  %vm493_vm15 = vweird.f32 %v1656_v48  ;;  %v386_v5 = vpop.xlane.xlu2 %385 }
  0xe0   : > { %v509_v2 = vmul.f32 0.5, %v508_v15  ;;  %v518_v18 = vmul.f32 %v1708_v30, %v517_v0  ;;  %v601_v9 = vsel %vm600_vm1, %v599_v1, %v597_v53  ;;  %v607_v21 = vperm.slane %v475_v62, %v1602_v34  ;;  %vm1751_vm1 = vmor %vm492_vm14, %vm493_vm15 }
  0xe1   : > { %v499_v13 = vmul.f32 0.5, %v498_v33  ;;  %967 = vrsqrt.f32 %v1727_v11  ;;  %v485_v58 = vsel %vm1737_vm0, %v1586_v29, %v481_v31  ;;  %v491_v28 = vmul.f32 %v1656_v48, %v490_v3 }
  0xe2   : > { %v510_v22 = vsub.f32 1.5, %v509_v2  ;;  %v519_v37 = vmul.f32 0.5, %v518_v18  ;;  %vm512_vm2 = vweird.f32 %v1589_v24  ;;  %vm513_vm5 = vweird.f32 %v1670_v54  ;;  %v298_v8 = vpop.xlane.xlu1 %297 }
  0xe3   : > { %v500_v35 = vsub.f32 1.5, %v499_v13  ;;  %v1747_v38 = vpop.eup %965  ;;  %vm502_vm3 = vweird.f32 %v1633_v27  ;;  %v1758_v34 = vmax.f32 %v386_v5, 1e-24  ;;  %v389_v29 = vpop.xlane.xlu0 %388  ;;  %v605_v40 = vsel %vm604_vm4, %v603_v10, %v601_v9  ;;  %vm1797_vm11 = vmor %vm512_vm2, %vm513_vm5 }
  0xe4   : > { %vm503_vm6 = vweird.f32 %v1695_v42  ;;  %v537_v25 = vmul.f32 %v1747_v38, %v1700_v16  ;;  %v611_v44 = vperm.slane %v485_v58, %v1570_v7  ;;  %v609_v50 = vsel %vm608_vm10, %v607_v21, %v605_v40 }
  0xe5   : > { %v501_v41 = vmul.f32 %v1695_v42, %v500_v35  ;;  %v511_v4 = vmul.f32 %v1670_v54, %v510_v22  ;;  %969 = vrsqrt.f32 %v1758_v34  ;;  %v495_v51 = vsel %vm1751_vm1, %v1656_v48, %v491_v28  ;;  %vm1778_vm8 = vmor %vm502_vm3, %vm503_vm6 }
  0xe6   : > { %v520_v47 = vsub.f32 1.5, %v519_v37  ;;  %v538_v55 = vmul.f32 %v1747_v38, %v537_v25  ;;  %v1773_v56 = vmax.f32 %v389_v29, 1e-24  ;;  %vm616_vm4 = vcmask 589312  }
  0xe7   : > { %v968_v20 = vpop.eup %967  ;;  %v618_v57 = vadd.s32 4294967224, %v1530_v39  ;;  %vm522_vm9 = vweird.f32 %v1640_v43  ;;  %v1783_v59 = vmax.f32 %v298_v8, 1e-24  ;;  %v505_v48 = vsel %vm1778_vm8, %v1695_v42, %v501_v41 }
  0xe8   : > { %vm523_vm10 = vweird.f32 %v1708_v30  ;;  %v539_v60 = vmul.f32 0.5, %v538_v55  ;;  %v527_v46 = vmul.f32 %v968_v20, %v1727_v11  ;;  %v613_v61 = vsel %vm612_vm13, %v611_v44, %v609_v50 }
  0xe9   : > { %v615_v27 = vperm.slane %v495_v51, %v1654_v45  ;;  %v622_v63 = vadd.s32 4294967216, %v1530_v39  ;;  %971 = vrsqrt.f32 %v1773_v56  ;;  %v515_v36 = vsel %vm1797_vm11, %v1670_v54, %v511_v4  ;;  %vm1813_vm13 = vmor %vm522_vm9, %vm523_vm10 }
  0xea   : > { %v521_v12 = vmul.f32 %v1708_v30, %v520_v47  ;;  %v528_v42 = vmul.f32 %v968_v20, %v527_v46  ;;  %973 = vrsqrt.f32 %v1783_v59  ;;  %vm620_vm12 = vcmask 654912  }
  0xeb   : > { %v1807_v45 = vpop.eup %969  ;;  %v619_v14 = vperm.slane %v505_v48, %v618_v57  ;;  %vm624_vm7 = vcmask 720512   ;;  %v540_v15 = vsub.f32 1.5, %v539_v60  ;;  %v626_v54 = vadd.s32 4294967208, %v1530_v39 }
  0xec   : > { %vm542_vm14 = vweird.f32 %v1700_v16  ;;  %v529_v19 = vmul.f32 0.5, %v528_v42  ;;  %v547_v23 = vmul.f32 %v1807_v45, %v1758_v34  ;;  %v617_v26 = vsel %vm616_vm4, %v615_v27, %v613_v61 }
  0xed   : > { %v623_v17 = vperm.slane %v515_v36, %v622_v63  ;;  %v630_v53 = vadd.s32 4294967200, %v1530_v39  ;;  %vm532_vm15 = vweird.f32 %v1727_v11  ;;  %v525_v43 = vsel %vm1813_vm13, %v1708_v30, %v521_v12 }
  0xee   : > { %v530_v31 = vsub.f32 1.5, %v529_v19  ;;  %vm533_vm0 = vweird.f32 %v968_v20  ;;  %v548_v32 = vmul.f32 %v1807_v45, %v547_v23  ;;  %v621_v62 = vsel %vm620_vm12, %v619_v14, %v617_v26 }
  0xef   : > { %v972_v2 = vpop.eup %971  ;;  %v541_v3 = vmul.f32 %v1747_v38, %v540_v15  ;;  %vm543_vm1 = vweird.f32 %v1747_v38  ;;  %vm552_vm2 = vweird.f32 %v1758_v34  ;;  %vm553_vm5 = vweird.f32 %v1807_v45  ;;  %vm534_vm6 = vmor %vm532_vm15, %vm533_vm0 }
  0xf0   : > { %v974_v33 = vpop.eup %973  ;;  %v531_v0 = vmul.f32 %v968_v20, %v530_v31  ;;  %v549_v1 = vmul.f32 0.5, %v548_v32  ;;  %v557_v30 = vmul.f32 %v972_v2, %v1773_v56  ;;  %vm628_vm3 = vcmask 786112   ;;  %vm1843_vm4 = vmor %vm542_vm14, %vm543_vm1 }
  0xf1   : > { %v627_v10 = vperm.slane %v525_v43, %v626_v54  ;;  %v634_v13 = vadd.s32 4294967192, %v1530_v39  ;;  %v301_v18 = vmul.f32 %v974_v33, %v1783_v59  ;;  %v625_v5 = vsel %vm624_vm7, %v623_v17, %v621_v62  ;;  %vm1852_vm8 = vmor %vm552_vm2, %vm553_vm5 }
  0xf2   : > { %v535_v52 = vsel %vm534_vm6, %v968_v20, %v531_v0  ;;  %v550_v21 = vsub.f32 1.5, %v549_v1  ;;  %v558_v22 = vmul.f32 %v972_v2, %v557_v30  ;;  %v545_v58 = vsel %vm1843_vm4, %v1747_v38, %v541_v3 }
  0xf3   : > { %v631_v28 = vperm.slane %v535_v52, %v630_v53  ;;  %v302_v16 = vmul.f32 %v974_v33, %v301_v18  ;;  %vm632_vm9 = vcmask 851712   ;;  %v629_v49 = vsel %vm628_vm3, %v627_v10, %v625_v5 }
  0xf4   : > { %v551_v35 = vmul.f32 %v1807_v45, %v550_v21  ;;  %v559_v37 = vmul.f32 0.5, %v558_v22  ;;  %v638_v29 = vadd.s32 4294967184, %v1530_v39  ;;  %vm562_vm10 = vweird.f32 %v1773_v56 }
  0xf5   : > { %v303_v38 = vmul.f32 0.5, %v302_v16  ;;  %v635_v34 = vperm.slane %v545_v58, %v634_v13  ;;  %vm563_vm11 = vweird.f32 %v972_v2  ;;  %v642_v25 = vadd.s32 4294967176, %v1530_v39 }
  0xf6   : > { %v555_v40 = vsel %vm1852_vm8, %v1807_v45, %v551_v35  ;;  %v560_v41 = vsub.f32 1.5, %v559_v37  ;;  %v633_v44 = vsel %vm632_vm9, %v631_v28, %v629_v49  ;;  %vm636_vm12 = vcmask 917312   ;;  %vm564_vm14 = vmor %vm562_vm10, %vm563_vm11 }
  0xf7   : > { %v304_v8 = vsub.f32 1.5, %v303_v38  ;;  %vm306_vm7 = vweird.f32 %v1783_v59  ;;  %vm307_vm13 = vweird.f32 %v974_v33  ;;  %v639_v4 = vperm.slane %v555_v40, %v638_v29 }
  0xf8   : > { %v561_v50 = vmul.f32 %v972_v2, %v560_v41  ;;  %v637_v20 = vsel %vm636_vm12, %v635_v34, %v633_v44  ;;  %vm640_vm15 = vcmask 982912   ;;  %vm308_vm0 = vmor %vm306_vm7, %vm307_vm13  ;;  %vm644_vm1 = vcmask 1048512  }
  0xf9   : > { %v305_v51 = vmul.f32 %v974_v33, %v304_v8  ;;  %v641_v48 = vsel %vm640_vm15, %v639_v4, %v637_v20 }
  0xfa   : > { %v565_v47 = vsel %vm564_vm14, %v972_v2, %v561_v50 }
  0xfb   : > { %v643_v57 = vperm.slane %v565_v47, %v642_v25  ;;  %v309_v59 = vsel %vm308_vm0, %v974_v33, %v305_v51 }
  0xfd   : > { %v271_v55 = vpop.f32.mrf.mxu0  ;;  %v645_v60 = vsel %vm644_vm1, %v643_v57, %v641_v48 }
  0xfe   : > { %v291_v39 = vpop.f32.mrf.mxu1 }
  0xff   : > { %v292_v7 = vadd.f32 %v291_v39, %v271_v55 }
 0x101   : > { %v566_v56 = vmul.f32 %v309_v59, %v292_v7 }
 0x103   : > { %v659_v46 = vmul.f32 %v645_v60, %v566_v56 }
 0x105   : > { %660 = vst [vmem:[%s218_s9] sm:$0xff] %v659_v46 }
 0x106   : > { %1062 = shalt.err (!%p1059_p11)
}
 0x107   : > { %812 = dma.vmem_to_hbm [thread:$0]  (%p1301_p0), %s677_s2, 128, %s679_s18, %s662_s22  }
 0x108 PF: > { %s2006_s30 = sld [smem:[#allocation15_spill]] }
 0x109   : > { %s2007_s19 = sld [smem:[#allocation11_spill]] }
 0x10e   : > { %p826_p4 = scmp.ge.s32.totalorder %s2006_s30, 2 }
 0x10f   : > { %s690_s29 = sand.u32 1, %s2007_s19  }
 0x110   : > { %p822_p8 = pnand %p826_p4, %p1305_p1  ;;  %s691_s26 = scalar_lea.sflag [#allocation4], %s690_s29 }
 0x112   : > { %p823_p12 = pneg %p822_p8 }
 0x114   : > { %1128 = dma.done.wait (%p823_p12), %s691_s26, 128  }
 0x115   : > { %1130 = vsyncadd (%p823_p12), %s691_s26, 4294967168  ;;  %s21_s22 = sadd.s32 1, %s2006_s30   ;;  %s2010_s9 = sld [smem:[#allocation12_spill]] }
 0x116   : > { %p1894_p13 = scmp.ge.s32.totalorder %s21_s22, 8   ;;  %s2011_s23 = smov %s1354_s10 }
 0x117   : > { %s2012_s18 = sld [smem:[#allocation14_spill]]  ;;  %s2014_s10 = smov %s1141_s11 }
 0x118   : > { %s2013_s20 = sld [smem:[#allocation18_spill]]  ;;  %s2015_s11 = smov %s1357_s15 }
 0x119   : > { %s2016_s12 = smov %s1149_s13  ;;  %s2017_s13 = smov %s1153_s14 }
 0x11a   : > { %s2018_s14 = smov %s1344_s0  ;;  %s2019_s15 = smov %s1161_s16 }
 0x11b   : > { %s2020_s16 = smov %s1165_s17  ;;  %s2021_s17 = smov %s2011_s23 }
 0x11c   : > { %s2022_s19 = smov %s1181_s21  ;;  %s2023_s21 = smov %s2029_s24 }
 0x11d   :  { %20 = sbr.rel (!%p1894_p13) target bundleno = 15 (0xf), region = 86 }
 0x122   :  { %697 = vsyncpa [#allocation3], 1 }
 0x123   :  { %699 = vsyncpa [#allocation3 + $0x1], 1 }
 0x124   :  { %700 = vsyncpa [#allocation6], 1 }
 0x125   :  { %702 = vsyncpa [#allocation6 + $0x1], 1 }
 0x126   :  { %703 = vsyncpa [#allocation4], 1 }
 0x127   :  { %705 = vsyncpa [#allocation4 + $0x1], 1 }

</bundles_post_ra>
